<compile_context>
chip_gen: v7x
topology: tpu7x:2x2x1
jax: 0.10.0
libtpu: 0.0.40
codegen_flags: <defaults>
</compile_context>

<pallas_src>
import functools
import math

import jax
import jax.numpy as jnp
from jax.experimental import pallas as pl
from jax.experimental.pallas import tpu as pltpu


def _magface_kernel(x_ref, xn_ref, lab_ref, w_ref, winv_ref, out_ref,
                    m_ref, l_ref, t_ref, *,
                    classnum, has_pad, u_margin, l_margin, u_a, l_a,
                    lambda_g, scale, easy_margin):
    c = pl.program_id(1)
    n_c = pl.num_programs(1)
    tb = x_ref.shape[0]
    tc = w_ref.shape[0]

    @pl.when(c == 0)
    def _init():
        m_ref[...] = jnp.full(m_ref.shape, -1e30, dtype=jnp.float32)
        l_ref[...] = jnp.zeros(l_ref.shape, dtype=jnp.float32)
        t_ref[...] = jnp.zeros(t_ref.shape, dtype=jnp.float32)

    x_norm = xn_ref[...]                      # (tb, 1) f32
    labels = lab_ref[...]                     # (tb, 1) i32

    # Raw x @ w_tile^T in bf16 with f32 accumulation (MXU).
    raw = jax.lax.dot_general(
        x_ref[...], w_ref[...],
        dimension_numbers=(((1,), (1,)), ((), ())),
        preferred_element_type=jnp.float32)   # (tb, tc)

    # Fold the logit scale into 1/|x| so the full tile only needs two muls + clip.
    inv_x = pl.reciprocal(jnp.maximum(x_norm, 1e-12), approx=True)   # (tb, 1), EUP
    s_cos = jnp.clip(raw * (scale * inv_x) * winv_ref[...],
                     -scale, scale)                                   # scale * cos_theta

    # One-hot mask for this class tile (class offset = c * tc).
    col0 = c * tc
    col = col0 + jax.lax.broadcasted_iota(jnp.int32, (tb, tc), 1)
    is_tgt = col == labels                                            # (tb, tc)
    # "target lives in this class tile" indicator from a (tb, 1) scalar compare.
    in_tile = jnp.logical_and(labels >= col0, labels < col0 + tc)     # (tb, 1)

    # Gather the target cosine (un-scaled) for the margin math: (tb, 1) work only.
    tgt_cos = (1.0 / scale) * jnp.sum(jnp.where(is_tgt, s_cos, 0.0),
                                      axis=-1, keepdims=True)

    ada = (u_margin - l_margin) / (u_a - l_a) * (x_norm - l_a) + l_margin
    cos_m = jnp.cos(ada)
    sin_m = jnp.sin(ada)
    tgt_sin = jnp.sqrt(jnp.maximum(1.0 - tgt_cos * tgt_cos, 0.0))
    tgt_cos_m = tgt_cos * cos_m - tgt_sin * sin_m
    if easy_margin:
        tgt_cos_m = jnp.where(tgt_cos > 0.0, tgt_cos_m, tgt_cos)
    else:
        mm = sin_m * ada          # sin(pi - a) * a == sin(a) * a
        threshold = -cos_m        # cos(pi - a)     == -cos(a)
        tgt_cos_m = jnp.where(tgt_cos > threshold, tgt_cos_m, tgt_cos - mm)
    tgt_logit = scale * tgt_cos_m             # (tb, 1)

    # Full-tile logits: target column gets the margin-modified logit.
    logits = jnp.where(is_tgt, tgt_logit, s_cos)
    if has_pad:
        logits = jnp.where(col < classnum, logits, -1e30)

    # Online logsumexp across class tiles.
    tile_max = jnp.max(logits, axis=-1, keepdims=True)
    m_new = jnp.maximum(m_ref[...], tile_max)
    alpha = jnp.exp(m_ref[...] - m_new)
    l_ref[...] = alpha * l_ref[...] + jnp.sum(jnp.exp(logits - m_new),
                                              axis=-1, keepdims=True)
    m_ref[...] = m_new
    t_ref[...] = t_ref[...] + jnp.where(in_tile, tgt_logit, 0.0)

    @pl.when(c == n_c - 1)
    def _finalize():
        lse = m_ref[...] + jnp.log(l_ref[...])          # (tb, 1)
        ce_sum = jnp.sum(lse - t_ref[...])              # sum over this batch tile
        g = (1.0 / (u_a * u_a)) * x_norm + 1.0 / x_norm
        out_ref[0, 0] = ce_sum + lambda_g * jnp.sum(g)  # scalar partial -> SMEM


def make_magface_loss(u_margin, l_margin, u_a, l_a, lambda_g,
                      scale=64.0, easy_margin=True,
                      block_c=512, block_b=None):
    cfg = dict(u_margin=float(u_margin), l_margin=float(l_margin),
               u_a=float(u_a), l_a=float(l_a), lambda_g=float(lambda_g),
               scale=float(scale), easy_margin=bool(easy_margin))

    @jax.jit
    def magface_loss(x, x_norm, weight, labels):
        B, F = x.shape
        C = weight.shape[0]

        # Class tile (lane-dense, multiple of 128); shrink for small class counts.
        tc = min(int(block_c), ((C + 127) // 128) * 128)
        assert tc % 128 == 0
        # Batch tile: >=128 for good MXU utilization when B allows it.
        tb = int(block_b) if block_b is not None else (128 if B % 128 == 0 else B)
        assert B % tb == 0 and (tb % 8 == 0 or tb == B)

        c_pad = ((C + tc - 1) // tc) * tc
        n_b, n_c = B // tb, c_pad // tc

        # Host-side prep: bf16 matmul operands (halves the weight HBM stream),
        # f32 inverse weight-row norms precomputed once, labels as int32.
        w32 = weight.astype(jnp.float32)
        w_inv = 1.0 / jnp.maximum(
            jnp.sqrt(jnp.sum(w32 * w32, axis=-1)), 1e-12)          # (C,)
        w_bf = w32.astype(jnp.bfloat16)
        if c_pad != C:
            w_bf = jnp.pad(w_bf, ((0, c_pad - C), (0, 0)))
            w_inv = jnp.pad(w_inv, (0, c_pad - C))
        w_inv_row = w_inv.reshape(1, c_pad)                        # lane-major

        x_bf = x.astype(jnp.bfloat16)
        xn2 = x_norm.reshape(B, 1).astype(jnp.float32)
        lab2 = labels.reshape(B, 1).astype(jnp.int32)

        kernel = functools.partial(_magface_kernel, classnum=C,
                                   has_pad=bool(c_pad != C), **cfg)

        partials = pl.pallas_call(
            kernel,
            out_shape=jax.ShapeDtypeStruct((n_b, 1), jnp.float32),
            grid=(n_b, n_c),
            in_specs=[
                pl.BlockSpec((tb, F), lambda b, c: (b, 0)),    # x (bf16)
                pl.BlockSpec((tb, 1), lambda b, c: (b, 0)),    # x_norm
                pl.BlockSpec((tb, 1), lambda b, c: (b, 0)),    # labels
                pl.BlockSpec((tc, F), lambda b, c: (c, 0)),    # weight tile (bf16)
                pl.BlockSpec((1, tc), lambda b, c: (0, c)),    # 1/|w_row| tile
            ],
            out_specs=pl.BlockSpec((1, 1), lambda b, c: (b, 0),
                                   memory_space=pltpu.MemorySpace.SMEM),
            scratch_shapes=[
                pltpu.VMEM((tb, 1), jnp.float32),   # running max
                pltpu.VMEM((tb, 1), jnp.float32),   # running sum-exp
                pltpu.VMEM((tb, 1), jnp.float32),   # target logit
            ],
            compiler_params=pltpu.CompilerParams(
                dimension_semantics=("parallel", "arbitrary")),
        )(x_bf, xn2, lab2, w_bf, w_inv_row)

        return jnp.sum(partials) / B

    return magface_loss


def init_magface_weight(key, classnum, num_features):
    """Mimic torch: uniform_(-1, 1).renorm_(2, 1, 1e-5).mul_(1e5) on a (C, F) tensor."""
    w = jax.random.uniform(key, (classnum, num_features),
                           minval=-1.0, maxval=1.0, dtype=jnp.float32)
    col_norm = jnp.sqrt(jnp.sum(w * w, axis=0, keepdims=True))     # sub-tensors along dim 1
    factor = jnp.where(col_norm > 1e-5, 1e-5 / (col_norm + 1e-7), 1.0)
    return w * factor * 1e5


def _reference_loss(x, x_norm, weight, labels, *, u_margin, l_margin, u_a, l_a,
                    lambda_g, scale, easy_margin):
    """Pure-JAX f32 reference mirroring the PyTorch forward (world_size == 1)."""
    x = x.astype(jnp.float32)
    x_norm = x_norm.reshape(-1, 1).astype(jnp.float32)
    ada = (u_margin - l_margin) / (u_a - l_a) * (x_norm - l_a) + l_margin
    cos_m, sin_m = jnp.cos(ada), jnp.sin(ada)
    xn = x / jnp.maximum(jnp.linalg.norm(x, axis=-1, keepdims=True), 1e-12)
    wn = weight / jnp.maximum(jnp.linalg.norm(weight, axis=-1, keepdims=True), 1e-12)
    cos = jnp.clip(xn @ wn.T, -1.0, 1.0)
    sin = jnp.sqrt(jnp.maximum(1.0 - cos * cos, 0.0))
    ctm = cos * cos_m - sin * sin_m
    if easy_margin:
        ctm = jnp.where(cos > 0.0, ctm, cos)
    else:
        mm = jnp.sin(math.pi - ada) * ada
        th = jnp.cos(math.pi - ada)
        ctm = jnp.where(cos > th, ctm, cos - mm)
    one_hot = jax.nn.one_hot(labels, weight.shape[0], dtype=jnp.float32)
    out = one_hot * (scale * ctm) + (1.0 - one_hot) * (scale * cos)
    lse = jax.scipy.special.logsumexp(out, axis=-1)
    tgt = jnp.sum(one_hot * out, axis=-1)
    ce = jnp.mean(lse - tgt)
    g = jnp.mean((1.0 / u_a ** 2) * x_norm + 1.0 / x_norm)
    return ce + lambda_g * g


if __name__ == "__main__":
    # Small, deterministic example shapes.  CLASSNUM is not a multiple of the class tile,
    # so the class-dim padding mask and the multi-step online logsumexp are exercised.
    B = 8
    NUM_FEATURES = 32
    CLASSNUM = 300
    TC = 128   # class tile -> 3 grid steps over the class dimension

    key = jax.random.PRNGKey(0)
    k_w, k_x, k_lab = jax.random.split(key, 3)

    weight = init_magface_weight(k_w, CLASSNUM, NUM_FEATURES)
    x = jax.random.normal(k_x, (B, NUM_FEATURES), dtype=jnp.float32) * 5.0
    x_norm = jnp.linalg.norm(x, axis=-1, keepdims=True)            # (B, 1)
    labels = jax.random.randint(k_lab, (B,), 0, CLASSNUM, dtype=jnp.int32)

    params = dict(u_margin=0.8, l_margin=0.45, u_a=110.0, l_a=10.0,
                  lambda_g=20.0, scale=64.0, easy_margin=True)

    loss_fn = make_magface_loss(block_c=TC, **params)
    loss = loss_fn(x, x_norm, weight, labels)
    jax.block_until_ready(loss)

    ref = _reference_loss(x, x_norm, weight, labels, **params)
    assert jnp.isfinite(loss), loss
    # bf16 matmul + approx reciprocal -> compare loosely against the f32 reference
    assert jnp.allclose(loss, ref, rtol=5e-2, atol=1e-2), (float(loss), float(ref))
    print("KERNEL_OK")
</pallas_src>

<mosaic_0001>
module attributes {stable_mosaic.version = 11 : i64} {
  func.func @_magface_kernel(%arg0: i32, %arg1: i32, %arg2: memref<8x32xbf16, #tpu.memory_space<vmem>>, %arg3: memref<8x1xf32, #tpu.memory_space<vmem>>, %arg4: memref<8x1xi32, #tpu.memory_space<vmem>>, %arg5: memref<128x32xbf16, #tpu.memory_space<vmem>>, %arg6: memref<1x128xf32, #tpu.memory_space<vmem>>, %arg7: memref<1x1xf32, #tpu.memory_space<smem>>, %arg8: memref<8x1xf32, #tpu.memory_space<vmem>>, %arg9: memref<8x1xf32, #tpu.memory_space<vmem>>, %arg10: memref<8x1xf32, #tpu.memory_space<vmem>>) attributes {dimension_semantics = [#tpu.dimension_semantics<parallel>, #tpu.dimension_semantics<arbitrary>], iteration_bounds = array<i64: 1, 3>, scalar_prefetch = 0 : i64, scratch_operands = 3 : i64, tpu.core_type = #tpu.core_type<tc>, window_params = [{transform_indices = @transform_0, window_bounds = array<i64: 8, 32>}, {transform_indices = @transform_1, window_bounds = array<i64: 8, 1>}, {transform_indices = @transform_2, window_bounds = array<i64: 8, 1>}, {transform_indices = @transform_3, window_bounds = array<i64: 128, 32>}, {transform_indices = @transform_4, window_bounds = array<i64: 1, 128>}, {transform_indices = @transform_5, window_bounds = array<i64: 1, 1>}]} {
    %c0_i32 = arith.constant 0 : i32
    %0 = arith.cmpi eq, %arg1, %c0_i32 : i32
    %1 = arith.extui %0 : i1 to i32
    %c0_i32_0 = arith.constant 0 : i32
    %2 = arith.cmpi ne, %1, %c0_i32_0 : i32
    scf.if %2 {
      %cst_44 = arith.constant -1.000000e+30 : f32
      %94 = vector.broadcast %cst_44 : f32 to vector<8x1xf32>
      %c0_45 = arith.constant 0 : index
      %c0_46 = arith.constant 0 : index
      %95 = vector.load %arg8[%c0_45, %c0_46] : memref<8x1xf32, #tpu.memory_space<vmem>>, vector<8x1xf32>
      tpu.vector_store %arg8[%c0_45, %c0_46], %94 {strides = array<i32>} : memref<8x1xf32, #tpu.memory_space<vmem>>, vector<8x1xf32>,
      %cst_47 = arith.constant 0.000000e+00 : f32
      %96 = vector.broadcast %cst_47 : f32 to vector<8x1xf32>
      %c0_48 = arith.constant 0 : index
      %c0_49 = arith.constant 0 : index
      %97 = vector.load %arg9[%c0_48, %c0_49] : memref<8x1xf32, #tpu.memory_space<vmem>>, vector<8x1xf32>
      tpu.vector_store %arg9[%c0_48, %c0_49], %96 {strides = array<i32>} : memref<8x1xf32, #tpu.memory_space<vmem>>, vector<8x1xf32>,
      %cst_50 = arith.constant 0.000000e+00 : f32
      %98 = vector.broadcast %cst_50 : f32 to vector<8x1xf32>
      %c0_51 = arith.constant 0 : index
      %c0_52 = arith.constant 0 : index
      %99 = vector.load %arg10[%c0_51, %c0_52] : memref<8x1xf32, #tpu.memory_space<vmem>>, vector<8x1xf32>
      tpu.vector_store %arg10[%c0_51, %c0_52], %98 {strides = array<i32>} : memref<8x1xf32, #tpu.memory_space<vmem>>, vector<8x1xf32>,
    } else {
    }
    %c0 = arith.constant 0 : index
    %c0_1 = arith.constant 0 : index
    %3 = vector.load %arg3[%c0, %c0_1] : memref<8x1xf32, #tpu.memory_space<vmem>>, vector<8x1xf32>
    %c0_2 = arith.constant 0 : index
    %c0_3 = arith.constant 0 : index
    %4 = vector.load %arg4[%c0_2, %c0_3] : memref<8x1xi32, #tpu.memory_space<vmem>>, vector<8x1xi32>
    %c0_4 = arith.constant 0 : index
    %c0_5 = arith.constant 0 : index
    %5 = vector.load %arg2[%c0_4, %c0_5] : memref<8x32xbf16, #tpu.memory_space<vmem>>, vector<8x32xbf16>
    %c0_6 = arith.constant 0 : index
    %c0_7 = arith.constant 0 : index
    %6 = vector.load %arg5[%c0_6, %c0_7] : memref<128x32xbf16, #tpu.memory_space<vmem>>, vector<128x32xbf16>
    %cst = arith.constant dense<0.000000e+00> : vector<8x128xf32>
    %7 = tpu.matmul %5, %6, %cst {dimension_numbers = #tpu.dot_dimension_numbers<[1], [1], [0], [0], [0, 0, 1, 0], [], []>} : vector<8x32xbf16>, vector<128x32xbf16>, vector<8x128xf32> -> vector<8x128xf32>
    %cst_8 = arith.constant 9.99999996E-13 : f32
    %8 = vector.broadcast %cst_8 : f32 to vector<8x1xf32>
    %9 = arith.maximumf %3, %8 : vector<8x1xf32>
    %10 = tpu.reciprocal %9 {approx = true} : vector<8x1xf32> -> vector<8x1xf32>
    %cst_9 = arith.constant 6.400000e+01 : f32
    %11 = vector.broadcast %cst_9 : f32 to vector<8x1xf32>
    %12 = arith.mulf %11, %10 : vector<8x1xf32>
    %13 = vector.broadcast %12 : vector<8x1xf32> to vector<8x128xf32>
    %14 = arith.mulf %7, %13 : vector<8x128xf32>
    %c0_10 = arith.constant 0 : index
    %c0_11 = arith.constant 0 : index
    %15 = vector.load %arg6[%c0_10, %c0_11] : memref<1x128xf32, #tpu.memory_space<vmem>>, vector<1x128xf32>
    %16 = vector.broadcast %15 : vector<1x128xf32> to vector<8x128xf32>
    %17 = arith.mulf %14, %16 : vector<8x128xf32>
    %cst_12 = arith.constant -6.400000e+01 : f32
    %cst_13 = arith.constant 6.400000e+01 : f32
    %18 = vector.broadcast %cst_12 : f32 to vector<8x128xf32>
    %19 = arith.maximumf %18, %17 : vector<8x128xf32>
    %20 = vector.broadcast %cst_13 : f32 to vector<8x128xf32>
    %21 = arith.minimumf %20, %19 : vector<8x128xf32>
    %c128_i32 = arith.constant 128 : i32
    %22 = arith.muli %arg1, %c128_i32 : i32
    %23 = tpu.iota {dimensions = array<i32: 1>} : vector<8x128xi32>
    %24 = vector.broadcast %22 : i32 to vector<8x128xi32>
    %25 = arith.addi %24, %23 : vector<8x128xi32>
    %26 = vector.broadcast %4 : vector<8x1xi32> to vector<8x128xi32>
    %27 = arith.cmpi eq, %25, %26 : vector<8x128xi32>
    %28 = vector.broadcast %22 : i32 to vector<8x1xi32>
    %29 = arith.cmpi sge, %4, %28 : vector<8x1xi32>
    %c128_i32_14 = arith.constant 128 : i32
    %30 = arith.addi %22, %c128_i32_14 : i32
    %31 = vector.broadcast %30 : i32 to vector<8x1xi32>
    %32 = arith.cmpi slt, %4, %31 : vector<8x1xi32>
    %33 = arith.andi %29, %32 : vector<8x1xi1>
    %cst_15 = arith.constant 0.000000e+00 : f32
    %34 = vector.broadcast %cst_15 : f32 to vector<8x128xf32>
    %35 = arith.select %27, %21, %34 : vector<8x128xi1>, vector<8x128xf32>
    %cst_16 = arith.constant dense<0.000000e+00> : vector<8xf32>
    %36 = vector.multi_reduction <add>, %35, %cst_16 [1] : vector<8x128xf32> to vector<8xf32>
    %37 = vector.shape_cast %36 : vector<8xf32> to vector<8x1xf32>
    %cst_17 = arith.constant 1.562500e-02 : f32
    %38 = vector.broadcast %cst_17 : f32 to vector<8x1xf32>
    %39 = arith.mulf %38, %37 : vector<8x1xf32>
    %cst_18 = arith.constant 1.000000e+01 : f32
    %40 = vector.broadcast %cst_18 : f32 to vector<8x1xf32>
    %41 = arith.subf %3, %40 : vector<8x1xf32>
    %cst_19 = arith.constant 3.500000e-03 : f32
    %42 = vector.broadcast %cst_19 : f32 to vector<8x1xf32>
    %43 = arith.mulf %42, %41 : vector<8x1xf32>
    %cst_20 = arith.constant 4.500000e-01 : f32
    %44 = vector.broadcast %cst_20 : f32 to vector<8x1xf32>
    %45 = arith.addf %43, %44 : vector<8x1xf32>
    %46 = math.cos %45 : vector<8x1xf32>
    %47 = math.sin %45 : vector<8x1xf32>
    %48 = arith.mulf %39, %39 : vector<8x1xf32>
    %cst_21 = arith.constant 1.000000e+00 : f32
    %49 = vector.broadcast %cst_21 : f32 to vector<8x1xf32>
    %50 = arith.subf %49, %48 : vector<8x1xf32>
    %cst_22 = arith.constant 0.000000e+00 : f32
    %51 = vector.broadcast %cst_22 : f32 to vector<8x1xf32>
    %52 = arith.maximumf %50, %51 : vector<8x1xf32>
    %53 = math.sqrt %52 : vector<8x1xf32>
    %54 = arith.mulf %39, %46 : vector<8x1xf32>
    %55 = arith.mulf %53, %47 : vector<8x1xf32>
    %56 = arith.subf %54, %55 : vector<8x1xf32>
    %cst_23 = arith.constant 0.000000e+00 : f32
    %57 = vector.broadcast %cst_23 : f32 to vector<8x1xf32>
    %58 = arith.cmpf ogt, %39, %57 : vector<8x1xf32>
    %59 = arith.select %58, %56, %39 : vector<8x1xi1>, vector<8x1xf32>
    %cst_24 = arith.constant 6.400000e+01 : f32
    %60 = vector.broadcast %cst_24 : f32 to vector<8x1xf32>
    %61 = arith.mulf %60, %59 : vector<8x1xf32>
    %62 = vector.shape_cast %61 : vector<8x1xf32> to vector<8x1xf32>
    %63 = vector.broadcast %62 : vector<8x1xf32> to vector<8x128xf32>
    %64 = arith.select %27, %63, %21 : vector<8x128xi1>, vector<8x128xf32>
    %c300_i32 = arith.constant 300 : i32
    %65 = vector.broadcast %c300_i32 : i32 to vector<8x128xi32>
    %66 = arith.cmpi slt, %25, %65 : vector<8x128xi32>
    %cst_25 = arith.constant -1.000000e+30 : f32
    %67 = vector.broadcast %cst_25 : f32 to vector<8x128xf32>
    %68 = arith.select %66, %64, %67 : vector<8x128xi1>, vector<8x128xf32>
    %cst_26 = arith.constant dense<0xFF800000> : vector<8xf32>
    %69 = vector.multi_reduction <maximumf>, %68, %cst_26 [1] : vector<8x128xf32> to vector<8xf32>
    %70 = vector.shape_cast %69 : vector<8xf32> to vector<8x1xf32>
    %c0_27 = arith.constant 0 : index
    %c0_28 = arith.constant 0 : index
    %71 = vector.load %arg8[%c0_27, %c0_28] : memref<8x1xf32, #tpu.memory_space<vmem>>, vector<8x1xf32>
    %72 = arith.maximumf %71, %70 : vector<8x1xf32>
    %c0_29 = arith.constant 0 : index
    %c0_30 = arith.constant 0 : index
    %73 = vector.load %arg8[%c0_29, %c0_30] : memref<8x1xf32, #tpu.memory_space<vmem>>, vector<8x1xf32>
    %74 = arith.subf %73, %72 : vector<8x1xf32>
    %75 = math.exp %74 : vector<8x1xf32>
    %c0_31 = arith.constant 0 : index
    %c0_32 = arith.constant 0 : index
    %76 = vector.load %arg9[%c0_31, %c0_32] : memref<8x1xf32, #tpu.memory_space<vmem>>, vector<8x1xf32>
    %77 = arith.mulf %75, %76 : vector<8x1xf32>
    %78 = vector.broadcast %72 : vector<8x1xf32> to vector<8x128xf32>
    %79 = arith.subf %68, %78 : vector<8x128xf32>
    %80 = math.exp %79 : vector<8x128xf32>
    %cst_33 = arith.constant dense<0.000000e+00> : vector<8xf32>
    %81 = vector.multi_reduction <add>, %80, %cst_33 [1] : vector<8x128xf32> to vector<8xf32>
    %82 = vector.shape_cast %81 : vector<8xf32> to vector<8x1xf32>
    %83 = arith.addf %77, %82 : vector<8x1xf32>
    %c0_34 = arith.constant 0 : index
    %c0_35 = arith.constant 0 : index
    %84 = vector.load %arg9[%c0_34, %c0_35] : memref<8x1xf32, #tpu.memory_space<vmem>>, vector<8x1xf32>
    tpu.vector_store %arg9[%c0_34, %c0_35], %83 {strides = array<i32>} : memref<8x1xf32, #tpu.memory_space<vmem>>, vector<8x1xf32>,
    %c0_36 = arith.constant 0 : index
    %c0_37 = arith.constant 0 : index
    %85 = vector.load %arg8[%c0_36, %c0_37] : memref<8x1xf32, #tpu.memory_space<vmem>>, vector<8x1xf32>
    tpu.vector_store %arg8[%c0_36, %c0_37], %72 {strides = array<i32>} : memref<8x1xf32, #tpu.memory_space<vmem>>, vector<8x1xf32>,
    %c0_38 = arith.constant 0 : index
    %c0_39 = arith.constant 0 : index
    %86 = vector.load %arg10[%c0_38, %c0_39] : memref<8x1xf32, #tpu.memory_space<vmem>>, vector<8x1xf32>
    %cst_40 = arith.constant 0.000000e+00 : f32
    %87 = vector.broadcast %cst_40 : f32 to vector<8x1xf32>
    %88 = arith.select %33, %61, %87 : vector<8x1xi1>, vector<8x1xf32>
    %89 = arith.addf %86, %88 : vector<8x1xf32>
    %c0_41 = arith.constant 0 : index
    %c0_42 = arith.constant 0 : index
    %90 = vector.load %arg10[%c0_41, %c0_42] : memref<8x1xf32, #tpu.memory_space<vmem>>, vector<8x1xf32>
    tpu.vector_store %arg10[%c0_41, %c0_42], %89 {strides = array<i32>} : memref<8x1xf32, #tpu.memory_space<vmem>>, vector<8x1xf32>,
    %c2_i32 = arith.constant 2 : i32
    %91 = arith.cmpi eq, %arg1, %c2_i32 : i32
    %92 = arith.extui %91 : i1 to i32
    %c0_i32_43 = arith.constant 0 : i32
    %93 = arith.cmpi ne, %92, %c0_i32_43 : i32
    scf.if %93 {
      %c0_44 = arith.constant 0 : index
      %c0_45 = arith.constant 0 : index
      %94 = vector.load %arg8[%c0_44, %c0_45] : memref<8x1xf32, #tpu.memory_space<vmem>>, vector<8x1xf32>
      %c0_46 = arith.constant 0 : index
      %c0_47 = arith.constant 0 : index
      %95 = vector.load %arg9[%c0_46, %c0_47] : memref<8x1xf32, #tpu.memory_space<vmem>>, vector<8x1xf32>
      %96 = math.log %95 : vector<8x1xf32>
      %97 = arith.addf %94, %96 : vector<8x1xf32>
      %c0_48 = arith.constant 0 : index
      %c0_49 = arith.constant 0 : index
      %98 = vector.load %arg10[%c0_48, %c0_49] : memref<8x1xf32, #tpu.memory_space<vmem>>, vector<8x1xf32>
      %99 = arith.subf %97, %98 : vector<8x1xf32>
      %100 = vector.shape_cast %99 : vector<8x1xf32> to vector<1x8x1xf32>
      %cst_50 = arith.constant dense<0.000000e+00> : vector<1xf32>
      %101 = vector.multi_reduction <add>, %100, %cst_50 [1, 2] : vector<1x8x1xf32> to vector<1xf32>
      %102 = vector.shape_cast %101 : vector<1xf32> to vector<1x1x1xf32>
      %103 = vector.extract %102[0, 0, 0] : f32 from vector<1x1x1xf32>
      %cst_51 = arith.constant 8.26446266E-5 : f32
      %104 = vector.broadcast %cst_51 : f32 to vector<8x1xf32>
      %105 = arith.mulf %104, %3 : vector<8x1xf32>
      %cst_52 = arith.constant 1.000000e+00 : f32
      %106 = vector.broadcast %cst_52 : f32 to vector<8x1xf32>
      %107 = arith.divf %106, %3 : vector<8x1xf32>
      %108 = arith.addf %105, %107 : vector<8x1xf32>
      %109 = vector.shape_cast %108 : vector<8x1xf32> to vector<1x8x1xf32>
      %cst_53 = arith.constant dense<0.000000e+00> : vector<1xf32>
      %110 = vector.multi_reduction <add>, %109, %cst_53 [1, 2] : vector<1x8x1xf32> to vector<1xf32>
      %111 = vector.shape_cast %110 : vector<1xf32> to vector<1x1x1xf32>
      %112 = vector.extract %111[0, 0, 0] : f32 from vector<1x1x1xf32>
      %cst_54 = arith.constant 2.000000e+01 : f32
      %113 = arith.mulf %cst_54, %112 : f32
      %114 = arith.addf %103, %113 : f32
      %c0_55 = arith.constant 0 : index
      %c0_56 = arith.constant 0 : index
      %115 = memref.load %arg7[%c0_55, %c0_56] : memref<1x1xf32, #tpu.memory_space<smem>>
      memref.store %114, %arg7[%c0_55, %c0_56] : memref<1x1xf32, #tpu.memory_space<smem>>
    } else {
    }
    return
  }
  func.func @transform_0(%arg0: i32, %arg1: i32) -> (i32, i32) {
    %c0_i32 = arith.constant 0 : i32
    %c0_i32_0 = arith.constant 0 : i32
    return %arg0, %c0_i32 : i32, i32
  }
  func.func @transform_1(%arg0: i32, %arg1: i32) -> (i32, i32) {
    %c0_i32 = arith.constant 0 : i32
    %c0_i32_0 = arith.constant 0 : i32
    return %arg0, %c0_i32 : i32, i32
  }
  func.func @transform_2(%arg0: i32, %arg1: i32) -> (i32, i32) {
    %c0_i32 = arith.constant 0 : i32
    %c0_i32_0 = arith.constant 0 : i32
    return %arg0, %c0_i32 : i32, i32
  }
  func.func @transform_3(%arg0: i32, %arg1: i32) -> (i32, i32) {
    %c0_i32 = arith.constant 0 : i32
    %c0_i32_0 = arith.constant 0 : i32
    return %arg1, %c0_i32 : i32, i32
  }
  func.func @transform_4(%arg0: i32, %arg1: i32) -> (i32, i32) {
    %c0_i32 = arith.constant 0 : i32
    %c0_i32_0 = arith.constant 0 : i32
    return %c0_i32, %arg1 : i32, i32
  }
  func.func @transform_5(%arg0: i32, %arg1: i32) -> (i32, i32) {
    %c0_i32 = arith.constant 0 : i32
    %c0_i32_0 = arith.constant 0 : i32
    return %arg0, %c0_i32 : i32, i32
  }
}

</mosaic_0001>

<bundles_post_ra>
// kernel: magface_loss.1
= control target key start
LH: loop header
LB: loop body
LE: loop exit
PB: predicated region body
PF: predicated region fallthrough
CT: control target
= control target key end

     0   :  { %10 = vsyncpa [#allocation6], 0  ;;  %s1103_s18 = smov 0   ;;  %s1105_s19 = smov 0   ;;  %s1272_s0 = inlined_call_operand.vmem [shape: bf16[8,32], index: 0, kind: input, shape index: {}]   ;;  %s1273_s1 = inlined_call_operand.vmem [shape: f32[8,1], index: 1, kind: input, shape index: {}]   ;;  %s1274_s2 = inlined_call_operand.vmem [shape: s32[8,1], index: 2, kind: input, shape index: {}]   ;;  %s1275_s3 = inlined_call_operand.vmem [shape: bf16[384,32], index: 3, kind: input, shape index: {}]   ;;  %s1276_s4 = inlined_call_operand.vmem [shape: f32[1,384], index: 4, kind: input, shape index: {}]   ;;  %s1277_s5 = inlined_call_operand.hbm [shape: f32[1,1], index: 5, kind: output, shape index: {}]  }
   0x1   :  { %s1107_s20 = smov 0  }
   0x2 LB: > { %s880_s21 = sadd.s32 4294967295, %s1059_s20   ;;  %s25_s22 = sadd.s32 1, %s1055_s19  ;;  %s1059_s20 = sphi %s1107_s20, %s16_s20   ;;  %s1055_s19 = sphi %s1105_s19, %s1279_s19   ;;  %s1051_s18 = sphi %s1103_s18, %s1278_s18  }
   0x3   : > { %p26_p0 = scmp.ge.s32.totalorder %s25_s22, 3  ;;  %p886_p1 = scmp.ge.s32.totalorder %s1059_s20, 1 }
   0x4   : > { %p236_p2 = scmp.lt.s32.totalorder %s1059_s20, 4 }
   0x5   : > { %s1281_s22 = smov (%p26_p0, %s25_s22), 0 }
   0x6   : > { %p237_p3 = pnand %p886_p1, %p236_p2 }
   0x7   : > { %s887_s23 = sshll.u32 (!%p237_p3), %s1051_s18, 4  ;;  %p292_p4 = scmp.lt.s32.totalorder (!%p237_p3), %s1051_s18, 2 }
   0x8   : > { %240 = sbr.rel (%p237_p3) target bundleno = 1294 (0x50e), region = 40  ;;  %p287_p5 = scmp.lt.s32.totalorder (!%p237_p3), %s887_s23, 47 }
   0x9   : > { %p889_p6 = scmp.ne.s32.totalorder (!%p237_p3), %s1051_s18, 0 }
   0xf   : > { %s1127_s24 = scalar_select %p292_p4, %s1051_s18, 2 }
  0x10   : > { %s1283_s23 = smov (!%p287_p5, %s887_s23), 47  ;;  %299 = sbr.rel (%p889_p6) target bundleno = 23 (0x17), region = 44 }
  0x11   : > { %s294_s27 = scalar_lea.vmem %s1276_s4, %s1127_s24  ;;  %s888_s28 = sshll.u32 %s1283_s23, 2  ;;  %vm300_vm0 = vcmask (!%p889_p6), 7168   ;;  %v1061_v0 = vmov (!%p889_p6), -1e+30   ;;  %v1062_v1 = vmov (!%p889_p6), 0.0  }
  0x12   : > { %s1136_s6 = scalar_lea.vmem %s1275_s3, %s888_s28  ;;  %301 = vst.msk [vmem:[#allocation2] sm:$0xff] (!%p889_p6), %vm300_vm0, %v1061_v0  ;;  %302 = vst.msk [vmem:[#allocation3] sm:$0xff] (!%p889_p6), %vm300_vm0, %v1062_v1 }
  0x13   : > { %303 = vst.msk [vmem:[#allocation4] sm:$0xff] (!%p889_p6), %vm300_vm0, %v1062_v1 }
  0x17 PF: > { %v997_v2 = vld [vmem:[%s1136_s6] sm:$0xff]   ;;  %v1063_v3 = vmov 0.0   ;;  %vm363_vm1 = vcmask 261120   ;;  %v998_v5 = vld [vmem:[%s1136_s6 + $0x8] sm:$0xff]   ;;  %vm1064_vm2 = vmmov 0   ;;  %v1065_v8 = vmov 0  }
  0x18   : > { %925 = vmatprep.subr.bf16.mxu0 %v1063_v3  ;;  %v368_v4 = vsel %vm363_vm1, %v997_v2, 0  ;;  %v371_v6 = vsel %vm363_vm1, %v998_v5, 0  ;;  %v1146_v7 = vld [vmem:[%s1273_s1] sm:$0xff]  ;;  %941 = vmatprep.mubr.msk.bf16.mxu0 %vm1064_vm2, %v1063_v3  ;;  %v999_v10 = vld [vmem:[%s1136_s6 + $0x10] sm:$0xff]   ;;  %v1000_v12 = vld [vmem:[%s1136_s6 + $0x18] sm:$0xff]   ;;  %v451_v26 = vlaneseq  ;;  %s901_s13 = sshll.u32 %s1051_s18, 7 }
  0x19   : > { %926 = vmatpush3.bf16.xpose.msra.mxu0 %v368_v4  ;;  %995 = vset.pattern.permute.xlu0 %v1065_v8  ;;  %v431_v9 = vmax.f32 %v1146_v7, 1e-12  ;;  %v374_v11 = vsel %vm363_vm1, %v999_v10, 0  ;;  %v377_v15 = vsel %vm363_vm1, %v1000_v12, 0  ;;  %v1156_v16 = vld [vmem:[%s1274_s2] sm:$0xff]  ;;  %v1002_v19 = vld [vmem:[%s1136_s6 + $0x28] sm:$0xff]   ;;  %v1175_v30 = vstv %s901_s13 }
  0x1a   : > { %927 = vmatprep.subr.bf16.mxu0 %v1063_v3  ;;  %996 = vset.pattern.permute.xlu1 %v1065_v8  ;;  %v1001_v17 = vld [vmem:[%s1136_s6 + $0x20] sm:$0xff]   ;;  %v383_v20 = vsel %vm363_vm1, %v1002_v19, 0  ;;  %v1003_v21 = vld [vmem:[%s1136_s6 + $0x30] sm:$0xff]   ;;  %v1004_v23 = vld [vmem:[%s1136_s6 + $0x38] sm:$0xff]   ;;  %v902_v27 = vadd.f32 -10.0, %v1146_v7  ;;  %v452_v29 = vand.u32 127, %v451_v26 }
  0x1b   : > { %1005 = vrcp.f32 %v431_v9  ;;  %v380_v18 = vsel %vm363_vm1, %v1001_v17, 0  ;;  %v386_v22 = vsel %vm363_vm1, %v1003_v21, 0  ;;  %v389_v24 = vsel %vm363_vm1, %v1004_v23, 0  ;;  %v306_v25 = vld [vmem:[%s1272_s0] sm:$0xf]  ;;  %s460_s16 = sadd.s32 128, %s901_s13 }
  0x1c   : > { %v469_v31 = vmul.f32 0.0035, %v902_v27  ;;  %v899_v33 = vld [vmem:[%s294_s27] ss:$0 sm:$0xff]  ;;  %v1183_v36 = vadd.s32 %v1175_v30, %v452_v29  ;;  %v1066_v51 = vmov 2102212464  }
  0x1d   : > { %v1067_v53 = vmov 920167782   ;;  %v1068_v58 = vmov 1326507024   ;;  %v1069_v60 = vmov 683565275  }
  0x1e   : > { %v1189_v41 = vadd.f32 0.45, %v469_v31  ;;  %v1070_v62 = vmov 2475754826   ;;  %v1071_v1 = vmov 2131351028  }
  0x1f   : > { %p911_p7 = scmp.ne.s32.totalorder %s1051_s18, 2 }
  0x20   : > { %v474_v44 = vand.u32 2139095040, %v1189_v41  ;;  %v471_v55 = vand.u32 2147483647, %v1189_v41  ;;  %vm473_vm11 = vcmp.lt.s32.totalorder %v1189_v41, 0 }
  0x21   : > { %928 = vmatpush3.bf16.xpose.msra.mxu0 %v371_v6 }
  0x22   : > { %929 = vmatprep.subr.bf16.mxu0 %v1063_v3  ;;  %v475_v45 = vshrl.u32 %v474_v44, 23  ;;  %v478_v6 = vand.u32 8388607, %v471_v55  ;;  %vm472_vm12 = vcmp.le.f32.partialorder %v471_v55, 0.7853982 }
  0x24   : > { %v903_v46 = vadd.s32 4294967169, %v475_v45 }
  0x25   : > { %v1006_v13 = vpop.eup %1005 }
  0x26   : > { %v433_v14 = vmul.f32 64.0, %v1006_v13  ;;  %v481_v47 = vadd.s32 1, %v903_v46  ;;  %v479_v13 = vor.u32 8388608, %v478_v6 }
  0x28   : > { %436 = vperm.xlu0 %995, %v433_v14   ;;  %vm482_vm4 = vcmp.gt.s32.totalorder %v481_v47, 0 }
  0x29   : > { %930 = vmatpush3.bf16.xpose.msra.mxu0 %v374_v11  ;;  %v483_v48 = vsel %vm482_vm4, %v481_v47, 0  ;;  %vm563_vm4 = vweird.f32 %v1189_v41 }
  0x2a   : > { %931 = vmatprep.subr.bf16.mxu0 %v1063_v3  ;;  %v485_v49 = vand.u32 31, %v483_v48  ;;  %v484_v56 = vshrl.u32 %v483_v48, 5 }
  0x2c   : > { %456 = vperm.xlu0 %995, %v1156_v16   ;;  %v486_v50 = vsub.s32 32, %v485_v49  ;;  %v497_v52 = vshll.u32 %v1066_v51, %v485_v49  ;;  %v500_v57 = vshll.u32 %v1067_v53, %v485_v49  ;;  %v488_v61 = vshll.u32 %v1069_v60, %v485_v49 }
  0x2d   : > { %v491_v63 = vshll.u32 %v1070_v62, %v485_v49  ;;  %vm506_vm5 = vcmp.lt.s32.totalorder %v484_v56, 4  ;;  %vm503_vm6 = vcmp.lt.s32.totalorder %v484_v56, 1  ;;  %vm505_vm7 = vcmp.lt.s32.totalorder %v484_v56, 3 }
  0x2e   : > { %v498_v54 = vshrl.u32 %v1067_v53, %v486_v50  ;;  %v501_v59 = vshrl.u32 %v1068_v58, %v486_v50  ;;  %v489_v0 = vshrl.u32 %v1070_v62, %v486_v50  ;;  %v492_v2 = vshrl.u32 %v1071_v1, %v486_v50 }
  0x2f   : > { %v495_v4 = vshrl.u32 %v1066_v51, %v486_v50  ;;  %vm504_vm8 = vcmp.lt.s32.totalorder %v484_v56, 2 }
  0x30   : > { %v499_v5 = vor.u32 %v498_v54, %v497_v52  ;;  %v502_v8 = vor.u32 %v501_v59, %v500_v57  ;;  %v490_v9 = vor.u32 %v489_v0, %v488_v61  ;;  %v493_v10 = vor.u32 %v492_v2, %v491_v63 }
  0x31   : > { %932 = vmatpush3.bf16.xpose.msra.mxu0 %v377_v15 }
  0x32   : > { %933 = vmatprep.subr.bf16.mxu0 %v1063_v3  ;;  %v512_v12 = vsel %vm506_vm5, %v499_v5, 920167782  ;;  %v516_v14 = vsel %vm506_vm5, %v502_v8, 1326507024  ;;  %v511_v15 = vsel %vm503_vm6, %v490_v9, %v493_v10 }
  0x33   : > { %v517_v19 = vsel %vm505_vm7, %v499_v5, %v516_v14 }
  0x39   : > { %934 = vmatpush3.bf16.xpose.msra.mxu0 %v380_v18 }
  0x3a   : > { %935 = vmatprep.subr.bf16.mxu0 %v1063_v3 }
  0x41   : > { %936 = vmatpush3.bf16.xpose.msra.mxu0 %v383_v20  ;;  %v519_v20 = vshll.u32 %v479_v13, 8 }
  0x42   : > { %937 = vmatprep.subr.bf16.mxu0 %v1063_v3 }
  0x49   : > { %938 = vmatpush3.bf16.xpose.msra.mxu0 %v386_v22 }
  0x4a   : > { %939 = vmatprep.subr.bf16.mxu0 %v1063_v3  ;;  %v494_v3 = vshll.u32 %v1071_v1, %v485_v49 }
  0x4c   : > { %v496_v11 = vor.u32 %v495_v4, %v494_v3 }
  0x4e   : > { %v513_v17 = vsel %vm505_vm7, %v496_v11, %v512_v12  ;;  %v515_v18 = vsel %vm503_vm6, %v493_v10, %v496_v11 }
  0x4f   : > { %v514_v21 = vsel %vm504_vm8, %v511_v15, %v513_v17  ;;  %v518_v22 = vsel %vm504_vm8, %v515_v18, %v517_v19 }
  0x50   : > { %v1214_v26 = vmul.u32.u64.low %v519_v20, %v518_v22  ;;  %v1215_v27 = vmul.u32.u64.high %v519_v20, %v518_v22, %v1214_v26 }
  0x51   : > { %940 = vmatpush3.bf16.xpose.msra.mxu0 %v389_v24  ;;  %v1211_v23 = vmul.u32.u64.low %v519_v20, %v514_v21  ;;  %v1212_v24 = vmul.u32.u64.high %v519_v20, %v514_v21, %v1211_v23 }
  0x53   : > { %vm528_vm9 = vc.u32 %v1215_v27, %v1211_v23  ;;  %v527_v52 = vadd.s32 %v1211_v23, %v1215_v27 }
  0x58   : > { %942 = vmatmul.mubr.msk.bf16.vlgmr.msra.gmra.mrb[0].mxu0 %vm363_vm1, %v306_v25  ;;  %v487_v25 = vshrl.u32 %v1069_v60, %v486_v50 }
  0x5a   : > { %v507_v29 = vsel %vm503_vm6, %v487_v25, %v490_v9 }
  0xa7   : > { %v437_v28 = vpop.permute.xlu0 %436 }
  0xab   : > { %v1185_v38 = vpop.permute.xlu0 %456 }
  0xac   : > { %vm458_vm3 = vcmp.eq.s32.totalorder %v1183_v36, %v1185_v38 }
 0x12b   : > { %v425_v32 = vpop.f32.mrb[0].mxu0 }
 0x12c   : > { %v439_v34 = vmul.f32 %v437_v28, %v425_v32  ;;  %v943_v35 = vpop.f32.mrb[1].mxu0  ;;  %v508_v28 = vsel %vm506_vm5, %v496_v11, 2102212464 }
 0x12d   : > { %v428_v37 = vpop.f32.mrb[2].mxu0  ;;  %v509_v31 = vsel %vm505_vm7, %v493_v10, %v508_v28 }
 0x12e   : > { %v944_v39 = vpop.f32.mrb[3].mxu0  ;;  %v1187_v40 = vmul.f32 %v899_v33, %v439_v34  ;;  %v510_v32 = vsel %vm504_vm8, %v507_v29, %v509_v31  ;;  %v529_v33 = vadd.s32 1, %v1212_v24  ;;  %v461_v31 = vstv %s460_s16 }
 0x12f   : > { %v526_v34 = vmul.u32 %v519_v20, %v510_v32  ;;  %vm462_vm7 = vcmp.lt.s32.totalorder %v1156_v16, %v461_v31  ;;  %vm459_vm8 = vcmp.ge.s32.totalorder %v1156_v16, %v1175_v30 }
 0x130   : > { %v900_v42 = vclamps-f32 %v1187_v40, 64.0  ;;  %v530_v35 = vsel %vm528_vm9, %v529_v33, %v1212_v24 }
 0x131   : > { %v531_v37 = vadd.s32 %v530_v35, %v526_v34 }
 0x132   : > { %v464_v43 = vsel %vm458_vm3, %v900_v42, 0.0 }
 0x133   : > { %465 = vadd.xlane.f32.xlu1 %v464_v43  ;;  %v532_v39 = vadd.s32 536870912, %v531_v37 }
 0x135   : > { %v533_v43 = vshrl.u32 %v532_v39, 30 }
 0x137   : > { %v534_v44 = vshll.u32 %v533_v43, 30  ;;  %v557_v3 = vsub.s32 4, %v533_v43 }
 0x139   : > { %v535_v45 = vsub.s32 %v531_v37, %v534_v44  ;;  %v558_v4 = vsel %vm473_vm11, %v557_v3, %v533_v43  ;;  %v725_v43 = vld [vmem:[#allocation4] sm:$0xff] }
 0x13a   : > { %v560_v8 = vsel %vm472_vm12, 0, %v558_v4 }
 0x13b   : > { %v537_v46 = vsub.s32 0, %v535_v45  ;;  %v667_v10 = vadd.s32 3, %v560_v8  ;;  %v564_v15 = vand.u32 3, %v560_v8 }
 0x13d   : > { %v904_v47 = vmin.u32 %v537_v46, %v535_v45  ;;  %v668_v17 = vand.u32 3, %v667_v10  ;;  %vm566_vm13 = vcmp.eq.s32.totalorder %v564_v15, 0  ;;  %vm569_vm14 = vcmp.eq.s32.totalorder %v564_v15, 2 }
 0x13e   : > { %vm565_vm1 = vcmp.lt.s32.totalorder %v564_v15, 2 }
 0x13f   : > { %v539_v48 = vclz %v904_v47  ;;  %vm670_vm15 = vcmp.eq.s32.totalorder %v668_v17, 0  ;;  %vm673_vm0 = vcmp.eq.s32.totalorder %v668_v17, 2  ;;  %vm669_vm2 = vcmp.lt.s32.totalorder %v668_v17, 2  ;;  %v704_v47 = vld [vmem:[#allocation2] sm:$0xff] }
 0x141   : > { %v905_v49 = vadd.s32 4294967294, %v539_v48 }
 0x143   : > { %vm906_vm10 = vcmp.lt.s32.totalorder %v905_v49, 0 }
 0x144   : > { %v542_v50 = vsel %vm906_vm10, 0, %v905_v49  ;;  %vm463_vm10 = vmand %vm459_vm8, %vm462_vm7 }
 0x145   : > { %v547_v51 = vsub.s32 4294967266, %v542_v50  ;;  %v543_v53 = vsub.s32 32, %v542_v50  ;;  %v544_v56 = vshll.u32 %v535_v45, %v542_v50 }
 0x147   : > { %v548_v54 = vadd.s32 127, %v547_v51  ;;  %v545_v57 = vshrl.u32 %v527_v52, %v543_v53 }
 0x149   : > { %v549_v58 = vshll.u32 %v548_v54, 23  ;;  %v546_v59 = vor.u32 %v545_v57, %v544_v56 }
 0x14b   : > { %v550_v60 = vor.u32 4788187, %v549_v58  ;;  %v553_v62 = vcvt.s32.f32 %v546_v59 }
 0x14d   : > { %v551_v61 = vand.u32 2147483647, %v550_v60 }
 0x14f   : > { %v554_v63 = vmul.f32 %v553_v62, %v551_v61  ;;  %v750_v62 = vmul.f32 (!%p911_p7), 8.264463e-05, %v1146_v7 }
 0x151   : > { %v555_v0 = vxor.u32 2147483648, %v554_v63 }
 0x153   : > { %v556_v1 = vsel %vm473_vm11, %v555_v0, %v554_v63  ;;  %vm722_vm11 = vcmask 7168  }
 0x154   : > { %v559_v2 = vsel %vm472_vm12, %v1189_v41, %v556_v1  ;;  %vm700_vm12 = vcmp.lt.s32.totalorder %v1183_v36, 300  ;;  %v709_v36 = vld [vmem:[#allocation3] sm:$0xff] }
 0x155   : > { %1007 = vcosq.f32 %v559_v2 }
 0x156   : > { %1009 = vsinq.f32 %v559_v2 }
 0x15f   : > { %v1008_v12 = vpop.eup %1007 }
 0x160   : > { %v1010_v14 = vpop.eup %1009  ;;  %v570_v55 = vxor.u32 2147483648, %v1008_v12 }
 0x161   : > { %v567_v18 = vxor.u32 2147483648, %v1010_v14 }
 0x162   : > { %v571_v20 = vsel %vm569_vm14, %v570_v55, %v1010_v14  ;;  %v675_v22 = vsel %vm673_vm0, %v570_v55, %v1010_v14 }
 0x163   : > { %v568_v19 = vsel %vm566_vm13, %v1008_v12, %v567_v18  ;;  %v672_v21 = vsel %vm670_vm15, %v1008_v12, %v567_v18 }
 0x164   : > { %v572_v23 = vsel %vm565_vm1, %v568_v19, %v571_v20  ;;  %v676_v24 = vsel %vm669_vm2, %v672_v21, %v675_v22 }
 0x165   : > { %v573_v27 = vsel %vm563_vm4, nan, %v572_v23  ;;  %v677_v28 = vsel %vm563_vm4, nan, %v676_v24 }
 0x1c0   : > { %v466_v5 = vpop.xlane.xlu1 %465 }
 0x1c1   : > { %v467_v6 = vmul.f32 0.015625, %v466_v5 }
 0x1c3   : > { %v678_v9 = vmul.f32 %v467_v6, %v467_v6  ;;  %v688_v34 = vmul.f32 %v573_v27, %v467_v6  ;;  %vm691_vm9 = vcmp.gt.f32.partialorder %v467_v6, 0.0 }
 0x1c5   : > { %v679_v11 = vsub.f32 1.0, %v678_v9 }
 0x1c7   : > { %v680_v13 = vmax.f32 %v679_v11, 0.0 }
 0x1c9   : > { %1011 = vrsqrt.f32 %v680_v13  ;;  %vm683_vm5 = vcmp.eq.f32.partialorder %v680_v13, inf  ;;  %v686_v29 = vand.u32 2147483648, %v680_v13  ;;  %vm685_vm6 = vcmp.eq.f32.partialorder %v680_v13, 0.0 }
 0x1d3   : > { %v1012_v25 = vpop.eup %1011 }
 0x1d4   : > { %v682_v26 = vmul.f32 %v1012_v25, %v680_v13 }
 0x1d6   : > { %v684_v32 = vsel %vm683_vm5, %v680_v13, %v682_v26 }
 0x1d7   : > { %v687_v33 = vsel %vm685_vm6, %v686_v29, %v684_v32 }
 0x1d8   : > { %v689_v35 = vmul.f32 %v687_v33, %v677_v28 }
 0x1da   : > { %v690_v41 = vsub.f32 %v688_v34, %v689_v35 }
 0x1dc   : > { %v692_v37 = vsel %vm691_vm9, %v690_v41, %v467_v6 }
 0x1dd   : > { %v693_v39 = vmul.f32 64.0, %v692_v37 }
 0x1df   : > { %696 = vperm.xlu1 %996, %v693_v39   ;;  %v726_v44 = vsel %vm463_vm10, %v693_v39, 0.0 }
 0x1e0   : > { %v727_v45 = vadd.f32 %v726_v44, %v725_v43 }
 0x1e2   : > { %728 = vst.msk [vmem:[#allocation4] sm:$0xff] %vm722_vm11, %v727_v45 }
 0x1e9   : > { %v738_v0 = vld [vmem:[#allocation4] sm:$0xff] (!%p911_p7) }
 0x25e   : > { %v697_v46 = vpop.permute.xlu1 %696 }
 0x25f   : > { %v699_v16 = vsel %vm458_vm3, %v697_v46, %v900_v42 }
 0x260   : > { %v701_v30 = vsel %vm700_vm12, %v699_v16, -1e+30 }
 0x261   : > { %702 = vmax.xlane.f32.xlu0 %v701_v30 }
 0x2ee   : > { %v703_v48 = vpop.xlane.xlu0 %702 }
 0x2ef   : > { %v705_v49 = vmax.f32 %v704_v47, %v703_v48 }
 0x2f1   : > { %v706_v50 = vsub.f32 %v704_v47, %v705_v49  ;;  %724 = vst.msk [vmem:[#allocation2] sm:$0xff] %vm722_vm11, %v705_v49  ;;  %713 = vperm.xlu1 %996, %v705_v49  }
 0x2f3   : > { %v707_v40 = vmul.f32 1.442695, %v706_v50 }
 0x2f8   : > { %v733_v60 = vld [vmem:[#allocation2] sm:$0xff] (!%p911_p7) }
 0x370   : > { %v714_v51 = vpop.permute.xlu1 %713 }
 0x371   : > { %v716_v52 = vsub.f32 %v701_v30, %v714_v51 }
 0x373   : > { %v717_v53 = vmul.f32 1.442695, %v716_v52 }
 0x375   : > { %1013 = vpow2.f32 %v717_v53 }
 0x376   : > { %1015 = vpow2.f32 %v707_v40 }
 0x37f   : > { %v1014_v54 = vpop.eup %1013 }
 0x380   : > { %719 = vadd.xlane.f32.xlu1 %v1014_v54  ;;  %v1016_v56 = vpop.eup %1015 }
 0x381   : > { %v710_v38 = vmul.f32 %v1016_v56, %v709_v36 }
 0x40a   : > { %732 = sbr.rel (%p911_p7) target bundleno = 1279 (0x4ff), region = 48 }
 0x40d   : > { %v720_v42 = vpop.xlane.xlu1 %719 }
 0x40e   : > { %v721_v57 = vadd.f32 %v720_v42, %v710_v38 }
 0x410   : > { %723 = vst.msk [vmem:[#allocation3] sm:$0xff] %vm722_vm11, %v721_v57 }
 0x417   : > { %v734_v58 = vld [vmem:[#allocation3] sm:$0xff] }
 0x418   : > { %1017 = vlog2.f32 %v734_v58 }
 0x419   : > { %1019 = vrcp.f32 %v1146_v7 }
 0x422   : > { %v1018_v59 = vpop.eup %1017 }
 0x423   : > { %v736_v61 = vmul.f32 0.6931472, %v1018_v59  ;;  %v1020_v63 = vpop.eup %1019 }
 0x424   : > { %v753_v3 = vadd.f32 %v1020_v63, %v750_v62 }
 0x425   : > { %v737_v1 = vadd.f32 %v736_v61, %v733_v60 }
 0x426   : > { %v754_v5 = vsel %vm722_vm11, %v753_v3, 0.0 }
 0x427   : > { %v739_v2 = vsub.f32 %v737_v1, %v738_v0 }
 0x429   : > { %v740_v4 = vsel %vm722_vm11, %v739_v2, 0.0 }
 0x42a   : > { %741 = vadd.xlane.f32.xlu0 %v740_v4 }
 0x42e   : > { %755 = vadd.xlane.f32.xlu0 %v754_v5 }
 0x4b7   : > { %v742_v6 = vpop.xlane.xlu0 %741 }
 0x4b8   : > { %v743_v8 = vrot.slane %v742_v6, 4 }
 0x4ba   : > { %v744_v9 = vadd.f32 %v743_v8, %v742_v6 }
 0x4bb   : > { %v756_v10 = vpop.xlane.xlu0 %755 }
 0x4bc   : > { %v745_v11 = vrot.slane %v744_v9, 2  ;;  %v757_v12 = vrot.slane %v756_v10, 4 }
 0x4be   : > { %v758_v13 = vadd.f32 %v757_v12, %v756_v10  ;;  %v746_v14 = vadd.f32 %v745_v11, %v744_v9 }
 0x4c0   : > { %v759_v7 = vrot.slane %v758_v13, 2  ;;  %v747_v15 = vrot.slane %v746_v14, 1 }
 0x4c2   : > { %v760_v17 = vadd.f32 %v759_v7, %v758_v13  ;;  %v748_v18 = vadd.f32 %v747_v15, %v746_v14 }
 0x4c4   : > { %949 = vpush %v748_v18  ;;  %v761_v55 = vrot.slane %v760_v17, 1 }
 0x4c6   : > { %v762_v19 = vadd.f32 %v761_v55, %v760_v17 }
 0x4c8   : > { %951 = vpush %v762_v19 }
 0x4f5   : > { %s950_s17 = spop %949 }
 0x4f9   : > { %s952_s18 = spop %951 }
 0x4fa   : > { %s764_s23 = smul.f32 20.0, %s952_s18 }
 0x4fc   : > { %s765_s24 = sadd.f32 %s950_s17, %s764_s23 }
 0x4fe   : > { %767 = sst [smem:[#allocation5]] %s765_s24 }
 0x4ff PF: > { %p957_p8 = scmp.eq.s32.totalorder %s880_s21, 2  ;;  %s1021_s27 = scalar_lea.hbm %s1277_s5, 16 }
 0x500   : > { %p1022_p9 = scmp.ne.s32.totalorder %s1277_s5, %s1021_s27  ;;  %p1027_p12 = scmp.lt.u32.totalorder %s1021_s27, %s1277_s5 }
 0x502   : > { %p1023_p10 = pnand %p1022_p9, %p957_p8 }
 0x504   : > { %p1024_p11 = pneg %p1023_p10 }
 0x506   : > { %p1029_p13 = pnand %p1027_p12, %p1024_p11 }
 0x508   : > { %1032 = shalt.err (!%p1029_p13)
}
 0x509   : > { %s1072_s7 = smov [#allocation5]  }
 0x50a   : > { %954 = dma.smem_to_hbm (%p957_p8), %s1072_s7, 16, %s1277_s5, [#allocation6]  }
 0x50b   : > { %1046 = dma.done.wait (%p957_p8), [#allocation6], 16  }
 0x50c   : > { %1048 = vsyncadd (%p957_p8), [#allocation6], 4294967280 }
 0x50d   : > { %783 = sfence }
 0x50e PF: > { %s16_s20 = sadd.s32 1, %s1059_s20   ;;  %s1278_s18 = smov %s1055_s19 }
 0x50f   : > { %p13_p0 = scmp.ge.s32.totalorder %s16_s20, 5   ;;  %s1279_s19 = smov %s1281_s22 }
 0x511   :  { %15 = sbr.rel (!%p13_p0) target bundleno = 2 (0x2), region = 89 }
 0x518   :  { %789 = vsyncpa [#allocation6], 1 }
 0x519   :  { %791 = vsyncpa [#allocation6 + $0x1], 1 }

</bundles_post_ra>
